<compile_context>
chip_gen: v7x
topology: tpu7x:2x2x1
jax: 0.10.0
libtpu: 0.0.40
codegen_flags: <defaults>
</compile_context>

<pallas_src>
import functools

import numpy as np

import jax
import jax.numpy as jnp
from jax.experimental import pallas as pl
from jax.experimental.pallas import tpu as pltpu


def _round_up(v, m):
    return (v + m - 1) // m * m


def _attention_kernel(x_ref, wqkv_ref, *rest, num_heads, head_dim, model_dim,
                      has_mask, has_qkv_bias):
    """One grid step = one batch element; all heads handled inside the kernel."""
    rest = list(rest)
    idx = 0
    if has_qkv_bias:
        bqkv_ref = rest[idx]; idx += 1
    wp_ref = rest[idx]; idx += 1
    bp_ref = rest[idx]; idx += 1
    if has_mask:
        mask_ref = rest[idx]; idx += 1
    o_ref = rest[idx]; idx += 1
    qkv_ref = rest[idx]; idx += 1       # VMEM scratch (Sp, Mp)
    ctx_ref = rest[idx]; idx += 1       # VMEM scratch (Sp, Dp)

    D = model_dim
    d = head_dim

    # Fused QKV projection for all heads at once (qk scale already folded into
    # the q columns of wqkv / bqkv by the wrapper).
    x = x_ref[0]                                                     # (Sp, Dp)
    qkv = jnp.dot(x, wqkv_ref[...], preferred_element_type=jnp.float32)
    if has_qkv_bias:
        qkv = qkv + bqkv_ref[...]
    qkv_ref[...] = qkv                                               # (Sp, Mp)

    # Zero the context scratch only if it has padded columns (avoids any
    # garbage * 0 = NaN risk in the final projection).
    if D < ctx_ref.shape[-1]:
        ctx_ref[...] = jnp.zeros_like(ctx_ref)

    if has_mask:
        mask = mask_ref[...]                                         # (Sp, Sp)

    for h in range(num_heads):
        q_h = qkv_ref[:, h * d:(h + 1) * d]                          # (Sp, d)
        k_h = qkv_ref[:, D + h * d:D + (h + 1) * d]                  # (Sp, d)
        v_h = qkv_ref[:, 2 * D + h * d:2 * D + (h + 1) * d]          # (Sp, d)

        # scores = q_h @ k_h^T (+ mask); scale already folded into q_h.
        s = jax.lax.dot_general(q_h, k_h, (((1,), (1,)), ((), ())),
                                preferred_element_type=jnp.float32)  # (Sp, Sp)
        if has_mask:
            s = s + mask

        # Numerically stable softmax with deferred normalization.
        m = jnp.max(s, axis=-1, keepdims=True)
        p = jnp.exp(s - m)
        denom = jnp.sum(p, axis=-1, keepdims=True)                   # (Sp, 1)
        ctx_h = jnp.dot(p, v_h, preferred_element_type=jnp.float32)  # (Sp, d)
        ctx_ref[:, h * d:(h + 1) * d] = ctx_h * pl.reciprocal(denom, approx=False)

    # Single output projection over all heads, written once.
    o_ref[0] = (jnp.dot(ctx_ref[...], wp_ref[...],
                        preferred_element_type=jnp.float32) + bp_ref[...])


def _local_mask(hw, local_k):
    """The mask the nn.Module builds for mixer='local', with -1e30 instead of
    -inf (identical numerics, NaN-safe). Shape (S, S)."""
    h, w = hw
    hk, wk = local_k
    s = h * w
    m = np.ones((s, h + hk - 1, w + wk - 1), dtype=np.float32)
    for i in range(h):
        for j in range(w):
            m[w * i + j, i:i + hk, j:j + wk] = 0.0
    mp = m[:, hk // 2:h + hk // 2, wk // 2:w + wk // 2].reshape(s, s)
    return np.where(mp == 1.0, -1e30, 0.0).astype(np.float32)


def attention(x, w_qkv, b_qkv, w_proj, b_proj, *, num_heads, mixer="global",
              hw=None, local_k=(7, 11), qk_scale=None):
    """Forward pass of svtr_ocr Attention.

    x:      (B, S, D) float32
    w_qkv:  (3D, D)  (PyTorch Linear weight, out x in)
    b_qkv:  (3D,) or None (qkv_bias=False, the module default)
    w_proj: (D, D);  b_proj: (D,)
    Returns (B, S, D) float32.
    """
    B, S, D = x.shape
    H = num_heads
    assert D % H == 0, "dim must be divisible by num_heads"
    d = D // H
    scale = float(qk_scale) if qk_scale is not None else float(d) ** -0.5

    Dp = _round_up(D, 128)      # lane-dense model dim (x / output / ctx width)
    Mp = _round_up(3 * D, 128)  # lane-dense packed QKV output width
    Sp = _round_up(S, 8)        # sublane-aligned sequence

    f32 = jnp.float32

    if (Sp, Dp) == (S, D):
        xp = x.astype(f32)
    else:
        xp = jnp.zeros((B, Sp, Dp), f32).at[:, :S, :D].set(x.astype(f32))

    # Packed QKV weight (Dp, Mp): columns [0:D]=Wq^T*scale, [D:2D]=Wk^T,
    # [2D:3D]=Wv^T, rest zero. The Linear output layout is (three, head, d),
    # which already gives the (h d) head-contiguous lane layout we want.
    wq = w_qkv[0:D].T.astype(f32) * scale
    wk = w_qkv[D:2 * D].T.astype(f32)
    wv = w_qkv[2 * D:3 * D].T.astype(f32)
    w_packed = (jnp.zeros((Dp, Mp), f32)
                .at[:D, 0:D].set(wq)
                .at[:D, D:2 * D].set(wk)
                .at[:D, 2 * D:3 * D].set(wv))

    has_qkv_bias = b_qkv is not None
    if has_qkv_bias:
        bq = b_qkv.astype(f32)
        b_packed = (jnp.zeros((1, Mp), f32)
                    .at[0, 0:D].set(bq[0:D] * scale)
                    .at[0, D:2 * D].set(bq[D:2 * D])
                    .at[0, 2 * D:3 * D].set(bq[2 * D:3 * D]))

    # Output projection: ctx is laid out (h d), matching the proj input dim.
    wp = jnp.zeros((Dp, Dp), f32).at[:D, :D].set(w_proj.T.astype(f32))
    bp = jnp.zeros((1, Dp), f32).at[0, :D].set(b_proj.astype(f32))

    # Additive attention mask only when it is actually nonzero.
    has_mask = (mixer == "local") or (Sp > S)
    if has_mask:
        mask_np = np.zeros((Sp, Sp), dtype=np.float32)
        if mixer == "local":
            assert hw is not None and hw[0] * hw[1] == S
            mask_np[:S, :S] = _local_mask(hw, local_k)
        if Sp > S:
            mask_np[:, S:] = -1e30     # padded keys never receive probability
        mask = jnp.asarray(mask_np)

    kernel = functools.partial(_attention_kernel, num_heads=H, head_dim=d,
                               model_dim=D, has_mask=has_mask,
                               has_qkv_bias=has_qkv_bias)

    # Weights / biases / mask use constant index maps -> fetched once, resident
    # in VMEM across the whole (batch) grid.
    in_specs = [
        pl.BlockSpec((1, Sp, Dp), lambda b: (b, 0, 0)),   # x
        pl.BlockSpec((Dp, Mp), lambda b: (0, 0)),         # packed QKV weight
    ]
    operands = [xp, w_packed]
    if has_qkv_bias:
        in_specs.append(pl.BlockSpec((1, Mp), lambda b: (0, 0)))
        operands.append(b_packed)
    in_specs += [
        pl.BlockSpec((Dp, Dp), lambda b: (0, 0)),         # Wproj
        pl.BlockSpec((1, Dp), lambda b: (0, 0)),          # bproj
    ]
    operands += [wp, bp]
    if has_mask:
        in_specs.append(pl.BlockSpec((Sp, Sp), lambda b: (0, 0)))
        operands.append(mask)

    out = pl.pallas_call(
        kernel,
        out_shape=jax.ShapeDtypeStruct((B, Sp, Dp), f32),
        grid_spec=pltpu.PrefetchScalarGridSpec(
            num_scalar_prefetch=0,
            grid=(B,),
            in_specs=in_specs,
            out_specs=pl.BlockSpec((1, Sp, Dp), lambda b: (b, 0, 0)),
            scratch_shapes=[
                pltpu.VMEM((Sp, Mp), f32),   # qkv for all heads
                pltpu.VMEM((Sp, Dp), f32),   # packed per-head context
            ],
        ),
        compiler_params=pltpu.CompilerParams(
            dimension_semantics=("parallel",),
        ),
    )(*operands)

    if (Sp, Dp) == (S, D):
        return out
    return out[:, :S, :D]


def _reference(x, w_qkv, b_qkv, w_proj, b_proj, *, num_heads, mask=None,
               qk_scale=None):
    """Pure-JAX reference matching the PyTorch forward."""
    B, S, D = x.shape
    H = num_heads
    d = D // H
    scale = qk_scale if qk_scale is not None else d ** -0.5
    qkv = x @ w_qkv.T
    if b_qkv is not None:
        qkv = qkv + b_qkv
    qkv = qkv.reshape(B, S, 3, H, d).transpose(2, 0, 3, 1, 4)    # (3, B, H, S, d)
    q, k, v = qkv[0] * scale, qkv[1], qkv[2]
    attn = jnp.einsum("bhqd,bhkd->bhqk", q, k)
    if mask is not None:
        attn = attn + mask[None, None]
    attn = jax.nn.softmax(attn, axis=-1)
    ctx = jnp.einsum("bhqk,bhkd->bhqd", attn, v)
    ctx = ctx.transpose(0, 2, 1, 3).reshape(B, S, D)
    return ctx @ w_proj.T + b_proj


if __name__ == "__main__":
    key = jax.random.PRNGKey(0)
    k_x, k_wqkv, k_bqkv, k_wp, k_bp = jax.random.split(key, 5)

    B, dim, num_heads = 2, 32, 8
    hw = (2, 4)                      # -> seq = 8
    S = hw[0] * hw[1]

    x = jax.random.normal(k_x, (B, S, dim), dtype=jnp.float32)
    w_qkv = jax.random.normal(k_wqkv, (3 * dim, dim), dtype=jnp.float32) * dim ** -0.5
    b_qkv = 0.1 * jax.random.normal(k_bqkv, (3 * dim,), dtype=jnp.float32)
    w_proj = jax.random.normal(k_wp, (dim, dim), dtype=jnp.float32) * dim ** -0.5
    b_proj = 0.1 * jax.random.normal(k_bp, (dim,), dtype=jnp.float32)

    # --- global mixer (module defaults: qkv_bias=False -> no bias operand) ---
    out_g = attention(x, w_qkv, None, w_proj, b_proj,
                      num_heads=num_heads, mixer="global", hw=hw)
    out_g = jax.block_until_ready(out_g)
    ref_g = _reference(x, w_qkv, None, w_proj, b_proj, num_heads=num_heads)
    assert out_g.shape == (B, S, dim), out_g.shape
    assert jnp.allclose(out_g, ref_g, atol=1e-4, rtol=1e-4), (
        float(jnp.max(jnp.abs(out_g - ref_g))))

    # --- local mixer with a real mask + qkv bias (local_k shrunk so it masks) ---
    local_k = (3, 3)
    out_l = attention(x, w_qkv, b_qkv, w_proj, b_proj,
                      num_heads=num_heads, mixer="local", hw=hw, local_k=local_k)
    out_l = jax.block_until_ready(out_l)
    ref_l = _reference(x, w_qkv, b_qkv, w_proj, b_proj, num_heads=num_heads,
                       mask=jnp.asarray(_local_mask(hw, local_k)))
    assert out_l.shape == (B, S, dim), out_l.shape
    assert jnp.allclose(out_l, ref_l, atol=1e-4, rtol=1e-4), (
        float(jnp.max(jnp.abs(out_l - ref_l))))

    print("KERNEL_OK")
</pallas_src>

<mosaic_0001>
module attributes {stable_mosaic.version = 11 : i64} {
  func.func @_attention_kernel(%arg0: i32, %arg1: memref<1x8x128xf32, #tpu.memory_space<vmem>>, %arg2: memref<128x128xf32, #tpu.memory_space<vmem>>, %arg3: memref<128x128xf32, #tpu.memory_space<vmem>>, %arg4: memref<1x128xf32, #tpu.memory_space<vmem>>, %arg5: memref<1x8x128xf32, #tpu.memory_space<vmem>>, %arg6: memref<8x128xf32, #tpu.memory_space<vmem>>, %arg7: memref<8x128xf32, #tpu.memory_space<vmem>>) attributes {dimension_semantics = [#tpu.dimension_semantics<parallel>], iteration_bounds = array<i64: 2>, scalar_prefetch = 0 : i64, scratch_operands = 2 : i64, tpu.core_type = #tpu.core_type<tc>, window_params = [{transform_indices = @transform_0, window_bounds = array<i64: 1, 8, 128>}, {pipeline_mode = #tpu.pipeline_mode<synchronous>, transform_indices = @transform_1, window_bounds = array<i64: 128, 128>}, {pipeline_mode = #tpu.pipeline_mode<synchronous>, transform_indices = @transform_2, window_bounds = array<i64: 128, 128>}, {pipeline_mode = #tpu.pipeline_mode<synchronous>, transform_indices = @transform_3, window_bounds = array<i64: 1, 128>}, {transform_indices = @transform_4, window_bounds = array<i64: 1, 8, 128>}]} {
    %c0 = arith.constant 0 : index
    %c0_0 = arith.constant 0 : index
    %c0_1 = arith.constant 0 : index
    %0 = vector.load %arg1[%c0, %c0_0, %c0_1] : memref<1x8x128xf32, #tpu.memory_space<vmem>>, vector<1x8x128xf32>
    %1 = vector.shape_cast %0 : vector<1x8x128xf32> to vector<8x128xf32>
    %c0_2 = arith.constant 0 : index
    %c0_3 = arith.constant 0 : index
    %2 = vector.load %arg2[%c0_2, %c0_3] : memref<128x128xf32, #tpu.memory_space<vmem>>, vector<128x128xf32>
    %cst = arith.constant dense<0.000000e+00> : vector<8x128xf32>
    %3 = tpu.matmul %1, %2, %cst {dimension_numbers = #tpu.dot_dimension_numbers<[1], [0], [0], [1], [0, 0, 1, 1], [], []>} : vector<8x128xf32>, vector<128x128xf32>, vector<8x128xf32> -> vector<8x128xf32>
    %c0_4 = arith.constant 0 : index
    %c0_5 = arith.constant 0 : index
    %4 = vector.load %arg6[%c0_4, %c0_5] : memref<8x128xf32, #tpu.memory_space<vmem>>, vector<8x128xf32>
    tpu.vector_store %arg6[%c0_4, %c0_5], %3 {strides = array<i32>} : memref<8x128xf32, #tpu.memory_space<vmem>>, vector<8x128xf32>,
    %cst_6 = arith.constant 0.000000e+00 : f32
    %5 = vector.broadcast %cst_6 : f32 to vector<8x128xf32>
    %c0_7 = arith.constant 0 : index
    %c0_8 = arith.constant 0 : index
    %6 = vector.load %arg7[%c0_7, %c0_8] : memref<8x128xf32, #tpu.memory_space<vmem>>, vector<8x128xf32>
    tpu.vector_store %arg7[%c0_7, %c0_8], %5 {strides = array<i32>} : memref<8x128xf32, #tpu.memory_space<vmem>>, vector<8x128xf32>,
    %c0_9 = arith.constant 0 : index
    %c0_10 = arith.constant 0 : index
    %7 = vector.load %arg6[%c0_9, %c0_10] : memref<8x128xf32, #tpu.memory_space<vmem>>, vector<8x4xf32>
    %c0_11 = arith.constant 0 : index
    %c32 = arith.constant 32 : index
    %8 = vector.load %arg6[%c0_11, %c32] : memref<8x128xf32, #tpu.memory_space<vmem>>, vector<8x4xf32>
    %c0_12 = arith.constant 0 : index
    %c64 = arith.constant 64 : index
    %9 = vector.load %arg6[%c0_12, %c64] : memref<8x128xf32, #tpu.memory_space<vmem>>, vector<8x4xf32>
    %cst_13 = arith.constant dense<0.000000e+00> : vector<8x8xf32>
    %10 = tpu.matmul %7, %8, %cst_13 {dimension_numbers = #tpu.dot_dimension_numbers<[1], [1], [0], [0], [0, 0, 1, 0], [], []>} : vector<8x4xf32>, vector<8x4xf32>, vector<8x8xf32> -> vector<8x8xf32>
    %cst_14 = arith.constant dense<0xFF800000> : vector<8xf32>
    %11 = vector.multi_reduction <maximumf>, %10, %cst_14 [1] : vector<8x8xf32> to vector<8xf32>
    %12 = vector.shape_cast %11 : vector<8xf32> to vector<8x1xf32>
    %13 = vector.broadcast %12 : vector<8x1xf32> to vector<8x8xf32>
    %14 = arith.subf %10, %13 : vector<8x8xf32>
    %15 = math.exp %14 : vector<8x8xf32>
    %cst_15 = arith.constant dense<0.000000e+00> : vector<8xf32>
    %16 = vector.multi_reduction <add>, %15, %cst_15 [1] : vector<8x8xf32> to vector<8xf32>
    %17 = vector.shape_cast %16 : vector<8xf32> to vector<8x1xf32>
    %cst_16 = arith.constant dense<0.000000e+00> : vector<8x4xf32>
    %18 = tpu.matmul %15, %9, %cst_16 {dimension_numbers = #tpu.dot_dimension_numbers<[1], [0], [0], [1], [0, 0, 1, 1], [], []>} : vector<8x8xf32>, vector<8x4xf32>, vector<8x4xf32> -> vector<8x4xf32>
    %19 = tpu.reciprocal %17 : vector<8x1xf32> -> vector<8x1xf32>
    %20 = vector.broadcast %19 : vector<8x1xf32> to vector<8x4xf32>
    %21 = arith.mulf %18, %20 : vector<8x4xf32>
    %c0_17 = arith.constant 0 : index
    %c0_18 = arith.constant 0 : index
    %22 = vector.load %arg7[%c0_17, %c0_18] : memref<8x128xf32, #tpu.memory_space<vmem>>, vector<8x4xf32>
    tpu.vector_store %arg7[%c0_17, %c0_18], %21 {strides = array<i32>} : memref<8x128xf32, #tpu.memory_space<vmem>>, vector<8x4xf32>,
    %c0_19 = arith.constant 0 : index
    %c4 = arith.constant 4 : index
    %23 = vector.load %arg6[%c0_19, %c4] : memref<8x128xf32, #tpu.memory_space<vmem>>, vector<8x4xf32>
    %c0_20 = arith.constant 0 : index
    %c36 = arith.constant 36 : index
    %24 = vector.load %arg6[%c0_20, %c36] : memref<8x128xf32, #tpu.memory_space<vmem>>, vector<8x4xf32>
    %c0_21 = arith.constant 0 : index
    %c68 = arith.constant 68 : index
    %25 = vector.load %arg6[%c0_21, %c68] : memref<8x128xf32, #tpu.memory_space<vmem>>, vector<8x4xf32>
    %cst_22 = arith.constant dense<0.000000e+00> : vector<8x8xf32>
    %26 = tpu.matmul %23, %24, %cst_22 {dimension_numbers = #tpu.dot_dimension_numbers<[1], [1], [0], [0], [0, 0, 1, 0], [], []>} : vector<8x4xf32>, vector<8x4xf32>, vector<8x8xf32> -> vector<8x8xf32>
    %cst_23 = arith.constant dense<0xFF800000> : vector<8xf32>
    %27 = vector.multi_reduction <maximumf>, %26, %cst_23 [1] : vector<8x8xf32> to vector<8xf32>
    %28 = vector.shape_cast %27 : vector<8xf32> to vector<8x1xf32>
    %29 = vector.broadcast %28 : vector<8x1xf32> to vector<8x8xf32>
    %30 = arith.subf %26, %29 : vector<8x8xf32>
    %31 = math.exp %30 : vector<8x8xf32>
    %cst_24 = arith.constant dense<0.000000e+00> : vector<8xf32>
    %32 = vector.multi_reduction <add>, %31, %cst_24 [1] : vector<8x8xf32> to vector<8xf32>
    %33 = vector.shape_cast %32 : vector<8xf32> to vector<8x1xf32>
    %cst_25 = arith.constant dense<0.000000e+00> : vector<8x4xf32>
    %34 = tpu.matmul %31, %25, %cst_25 {dimension_numbers = #tpu.dot_dimension_numbers<[1], [0], [0], [1], [0, 0, 1, 1], [], []>} : vector<8x8xf32>, vector<8x4xf32>, vector<8x4xf32> -> vector<8x4xf32>
    %35 = tpu.reciprocal %33 : vector<8x1xf32> -> vector<8x1xf32>
    %36 = vector.broadcast %35 : vector<8x1xf32> to vector<8x4xf32>
    %37 = arith.mulf %34, %36 : vector<8x4xf32>
    %c0_26 = arith.constant 0 : index
    %c4_27 = arith.constant 4 : index
    %38 = vector.load %arg7[%c0_26, %c4_27] : memref<8x128xf32, #tpu.memory_space<vmem>>, vector<8x4xf32>
    tpu.vector_store %arg7[%c0_26, %c4_27], %37 {strides = array<i32>} : memref<8x128xf32, #tpu.memory_space<vmem>>, vector<8x4xf32>,
    %c0_28 = arith.constant 0 : index
    %c8 = arith.constant 8 : index
    %39 = vector.load %arg6[%c0_28, %c8] : memref<8x128xf32, #tpu.memory_space<vmem>>, vector<8x4xf32>
    %c0_29 = arith.constant 0 : index
    %c40 = arith.constant 40 : index
    %40 = vector.load %arg6[%c0_29, %c40] : memref<8x128xf32, #tpu.memory_space<vmem>>, vector<8x4xf32>
    %c0_30 = arith.constant 0 : index
    %c72 = arith.constant 72 : index
    %41 = vector.load %arg6[%c0_30, %c72] : memref<8x128xf32, #tpu.memory_space<vmem>>, vector<8x4xf32>
    %cst_31 = arith.constant dense<0.000000e+00> : vector<8x8xf32>
    %42 = tpu.matmul %39, %40, %cst_31 {dimension_numbers = #tpu.dot_dimension_numbers<[1], [1], [0], [0], [0, 0, 1, 0], [], []>} : vector<8x4xf32>, vector<8x4xf32>, vector<8x8xf32> -> vector<8x8xf32>
    %cst_32 = arith.constant dense<0xFF800000> : vector<8xf32>
    %43 = vector.multi_reduction <maximumf>, %42, %cst_32 [1] : vector<8x8xf32> to vector<8xf32>
    %44 = vector.shape_cast %43 : vector<8xf32> to vector<8x1xf32>
    %45 = vector.broadcast %44 : vector<8x1xf32> to vector<8x8xf32>
    %46 = arith.subf %42, %45 : vector<8x8xf32>
    %47 = math.exp %46 : vector<8x8xf32>
    %cst_33 = arith.constant dense<0.000000e+00> : vector<8xf32>
    %48 = vector.multi_reduction <add>, %47, %cst_33 [1] : vector<8x8xf32> to vector<8xf32>
    %49 = vector.shape_cast %48 : vector<8xf32> to vector<8x1xf32>
    %cst_34 = arith.constant dense<0.000000e+00> : vector<8x4xf32>
    %50 = tpu.matmul %47, %41, %cst_34 {dimension_numbers = #tpu.dot_dimension_numbers<[1], [0], [0], [1], [0, 0, 1, 1], [], []>} : vector<8x8xf32>, vector<8x4xf32>, vector<8x4xf32> -> vector<8x4xf32>
    %51 = tpu.reciprocal %49 : vector<8x1xf32> -> vector<8x1xf32>
    %52 = vector.broadcast %51 : vector<8x1xf32> to vector<8x4xf32>
    %53 = arith.mulf %50, %52 : vector<8x4xf32>
    %c0_35 = arith.constant 0 : index
    %c8_36 = arith.constant 8 : index
    %54 = vector.load %arg7[%c0_35, %c8_36] : memref<8x128xf32, #tpu.memory_space<vmem>>, vector<8x4xf32>
    tpu.vector_store %arg7[%c0_35, %c8_36], %53 {strides = array<i32>} : memref<8x128xf32, #tpu.memory_space<vmem>>, vector<8x4xf32>,
    %c0_37 = arith.constant 0 : index
    %c12 = arith.constant 12 : index
    %55 = vector.load %arg6[%c0_37, %c12] : memref<8x128xf32, #tpu.memory_space<vmem>>, vector<8x4xf32>
    %c0_38 = arith.constant 0 : index
    %c44 = arith.constant 44 : index
    %56 = vector.load %arg6[%c0_38, %c44] : memref<8x128xf32, #tpu.memory_space<vmem>>, vector<8x4xf32>
    %c0_39 = arith.constant 0 : index
    %c76 = arith.constant 76 : index
    %57 = vector.load %arg6[%c0_39, %c76] : memref<8x128xf32, #tpu.memory_space<vmem>>, vector<8x4xf32>
    %cst_40 = arith.constant dense<0.000000e+00> : vector<8x8xf32>
    %58 = tpu.matmul %55, %56, %cst_40 {dimension_numbers = #tpu.dot_dimension_numbers<[1], [1], [0], [0], [0, 0, 1, 0], [], []>} : vector<8x4xf32>, vector<8x4xf32>, vector<8x8xf32> -> vector<8x8xf32>
    %cst_41 = arith.constant dense<0xFF800000> : vector<8xf32>
    %59 = vector.multi_reduction <maximumf>, %58, %cst_41 [1] : vector<8x8xf32> to vector<8xf32>
    %60 = vector.shape_cast %59 : vector<8xf32> to vector<8x1xf32>
    %61 = vector.broadcast %60 : vector<8x1xf32> to vector<8x8xf32>
    %62 = arith.subf %58, %61 : vector<8x8xf32>
    %63 = math.exp %62 : vector<8x8xf32>
    %cst_42 = arith.constant dense<0.000000e+00> : vector<8xf32>
    %64 = vector.multi_reduction <add>, %63, %cst_42 [1] : vector<8x8xf32> to vector<8xf32>
    %65 = vector.shape_cast %64 : vector<8xf32> to vector<8x1xf32>
    %cst_43 = arith.constant dense<0.000000e+00> : vector<8x4xf32>
    %66 = tpu.matmul %63, %57, %cst_43 {dimension_numbers = #tpu.dot_dimension_numbers<[1], [0], [0], [1], [0, 0, 1, 1], [], []>} : vector<8x8xf32>, vector<8x4xf32>, vector<8x4xf32> -> vector<8x4xf32>
    %67 = tpu.reciprocal %65 : vector<8x1xf32> -> vector<8x1xf32>
    %68 = vector.broadcast %67 : vector<8x1xf32> to vector<8x4xf32>
    %69 = arith.mulf %66, %68 : vector<8x4xf32>
    %c0_44 = arith.constant 0 : index
    %c12_45 = arith.constant 12 : index
    %70 = vector.load %arg7[%c0_44, %c12_45] : memref<8x128xf32, #tpu.memory_space<vmem>>, vector<8x4xf32>
    tpu.vector_store %arg7[%c0_44, %c12_45], %69 {strides = array<i32>} : memref<8x128xf32, #tpu.memory_space<vmem>>, vector<8x4xf32>,
    %c0_46 = arith.constant 0 : index
    %c16 = arith.constant 16 : index
    %71 = vector.load %arg6[%c0_46, %c16] : memref<8x128xf32, #tpu.memory_space<vmem>>, vector<8x4xf32>
    %c0_47 = arith.constant 0 : index
    %c48 = arith.constant 48 : index
    %72 = vector.load %arg6[%c0_47, %c48] : memref<8x128xf32, #tpu.memory_space<vmem>>, vector<8x4xf32>
    %c0_48 = arith.constant 0 : index
    %c80 = arith.constant 80 : index
    %73 = vector.load %arg6[%c0_48, %c80] : memref<8x128xf32, #tpu.memory_space<vmem>>, vector<8x4xf32>
    %cst_49 = arith.constant dense<0.000000e+00> : vector<8x8xf32>
    %74 = tpu.matmul %71, %72, %cst_49 {dimension_numbers = #tpu.dot_dimension_numbers<[1], [1], [0], [0], [0, 0, 1, 0], [], []>} : vector<8x4xf32>, vector<8x4xf32>, vector<8x8xf32> -> vector<8x8xf32>
    %cst_50 = arith.constant dense<0xFF800000> : vector<8xf32>
    %75 = vector.multi_reduction <maximumf>, %74, %cst_50 [1] : vector<8x8xf32> to vector<8xf32>
    %76 = vector.shape_cast %75 : vector<8xf32> to vector<8x1xf32>
    %77 = vector.broadcast %76 : vector<8x1xf32> to vector<8x8xf32>
    %78 = arith.subf %74, %77 : vector<8x8xf32>
    %79 = math.exp %78 : vector<8x8xf32>
    %cst_51 = arith.constant dense<0.000000e+00> : vector<8xf32>
    %80 = vector.multi_reduction <add>, %79, %cst_51 [1] : vector<8x8xf32> to vector<8xf32>
    %81 = vector.shape_cast %80 : vector<8xf32> to vector<8x1xf32>
    %cst_52 = arith.constant dense<0.000000e+00> : vector<8x4xf32>
    %82 = tpu.matmul %79, %73, %cst_52 {dimension_numbers = #tpu.dot_dimension_numbers<[1], [0], [0], [1], [0, 0, 1, 1], [], []>} : vector<8x8xf32>, vector<8x4xf32>, vector<8x4xf32> -> vector<8x4xf32>
    %83 = tpu.reciprocal %81 : vector<8x1xf32> -> vector<8x1xf32>
    %84 = vector.broadcast %83 : vector<8x1xf32> to vector<8x4xf32>
    %85 = arith.mulf %82, %84 : vector<8x4xf32>
    %c0_53 = arith.constant 0 : index
    %c16_54 = arith.constant 16 : index
    %86 = vector.load %arg7[%c0_53, %c16_54] : memref<8x128xf32, #tpu.memory_space<vmem>>, vector<8x4xf32>
    tpu.vector_store %arg7[%c0_53, %c16_54], %85 {strides = array<i32>} : memref<8x128xf32, #tpu.memory_space<vmem>>, vector<8x4xf32>,
    %c0_55 = arith.constant 0 : index
    %c20 = arith.constant 20 : index
    %87 = vector.load %arg6[%c0_55, %c20] : memref<8x128xf32, #tpu.memory_space<vmem>>, vector<8x4xf32>
    %c0_56 = arith.constant 0 : index
    %c52 = arith.constant 52 : index
    %88 = vector.load %arg6[%c0_56, %c52] : memref<8x128xf32, #tpu.memory_space<vmem>>, vector<8x4xf32>
    %c0_57 = arith.constant 0 : index
    %c84 = arith.constant 84 : index
    %89 = vector.load %arg6[%c0_57, %c84] : memref<8x128xf32, #tpu.memory_space<vmem>>, vector<8x4xf32>
    %cst_58 = arith.constant dense<0.000000e+00> : vector<8x8xf32>
    %90 = tpu.matmul %87, %88, %cst_58 {dimension_numbers = #tpu.dot_dimension_numbers<[1], [1], [0], [0], [0, 0, 1, 0], [], []>} : vector<8x4xf32>, vector<8x4xf32>, vector<8x8xf32> -> vector<8x8xf32>
    %cst_59 = arith.constant dense<0xFF800000> : vector<8xf32>
    %91 = vector.multi_reduction <maximumf>, %90, %cst_59 [1] : vector<8x8xf32> to vector<8xf32>
    %92 = vector.shape_cast %91 : vector<8xf32> to vector<8x1xf32>
    %93 = vector.broadcast %92 : vector<8x1xf32> to vector<8x8xf32>
    %94 = arith.subf %90, %93 : vector<8x8xf32>
    %95 = math.exp %94 : vector<8x8xf32>
    %cst_60 = arith.constant dense<0.000000e+00> : vector<8xf32>
    %96 = vector.multi_reduction <add>, %95, %cst_60 [1] : vector<8x8xf32> to vector<8xf32>
    %97 = vector.shape_cast %96 : vector<8xf32> to vector<8x1xf32>
    %cst_61 = arith.constant dense<0.000000e+00> : vector<8x4xf32>
    %98 = tpu.matmul %95, %89, %cst_61 {dimension_numbers = #tpu.dot_dimension_numbers<[1], [0], [0], [1], [0, 0, 1, 1], [], []>} : vector<8x8xf32>, vector<8x4xf32>, vector<8x4xf32> -> vector<8x4xf32>
    %99 = tpu.reciprocal %97 : vector<8x1xf32> -> vector<8x1xf32>
    %100 = vector.broadcast %99 : vector<8x1xf32> to vector<8x4xf32>
    %101 = arith.mulf %98, %100 : vector<8x4xf32>
    %c0_62 = arith.constant 0 : index
    %c20_63 = arith.constant 20 : index
    %102 = vector.load %arg7[%c0_62, %c20_63] : memref<8x128xf32, #tpu.memory_space<vmem>>, vector<8x4xf32>
    tpu.vector_store %arg7[%c0_62, %c20_63], %101 {strides = array<i32>} : memref<8x128xf32, #tpu.memory_space<vmem>>, vector<8x4xf32>,
    %c0_64 = arith.constant 0 : index
    %c24 = arith.constant 24 : index
    %103 = vector.load %arg6[%c0_64, %c24] : memref<8x128xf32, #tpu.memory_space<vmem>>, vector<8x4xf32>
    %c0_65 = arith.constant 0 : index
    %c56 = arith.constant 56 : index
    %104 = vector.load %arg6[%c0_65, %c56] : memref<8x128xf32, #tpu.memory_space<vmem>>, vector<8x4xf32>
    %c0_66 = arith.constant 0 : index
    %c88 = arith.constant 88 : index
    %105 = vector.load %arg6[%c0_66, %c88] : memref<8x128xf32, #tpu.memory_space<vmem>>, vector<8x4xf32>
    %cst_67 = arith.constant dense<0.000000e+00> : vector<8x8xf32>
    %106 = tpu.matmul %103, %104, %cst_67 {dimension_numbers = #tpu.dot_dimension_numbers<[1], [1], [0], [0], [0, 0, 1, 0], [], []>} : vector<8x4xf32>, vector<8x4xf32>, vector<8x8xf32> -> vector<8x8xf32>
    %cst_68 = arith.constant dense<0xFF800000> : vector<8xf32>
    %107 = vector.multi_reduction <maximumf>, %106, %cst_68 [1] : vector<8x8xf32> to vector<8xf32>
    %108 = vector.shape_cast %107 : vector<8xf32> to vector<8x1xf32>
    %109 = vector.broadcast %108 : vector<8x1xf32> to vector<8x8xf32>
    %110 = arith.subf %106, %109 : vector<8x8xf32>
    %111 = math.exp %110 : vector<8x8xf32>
    %cst_69 = arith.constant dense<0.000000e+00> : vector<8xf32>
    %112 = vector.multi_reduction <add>, %111, %cst_69 [1] : vector<8x8xf32> to vector<8xf32>
    %113 = vector.shape_cast %112 : vector<8xf32> to vector<8x1xf32>
    %cst_70 = arith.constant dense<0.000000e+00> : vector<8x4xf32>
    %114 = tpu.matmul %111, %105, %cst_70 {dimension_numbers = #tpu.dot_dimension_numbers<[1], [0], [0], [1], [0, 0, 1, 1], [], []>} : vector<8x8xf32>, vector<8x4xf32>, vector<8x4xf32> -> vector<8x4xf32>
    %115 = tpu.reciprocal %113 : vector<8x1xf32> -> vector<8x1xf32>
    %116 = vector.broadcast %115 : vector<8x1xf32> to vector<8x4xf32>
    %117 = arith.mulf %114, %116 : vector<8x4xf32>
    %c0_71 = arith.constant 0 : index
    %c24_72 = arith.constant 24 : index
    %118 = vector.load %arg7[%c0_71, %c24_72] : memref<8x128xf32, #tpu.memory_space<vmem>>, vector<8x4xf32>
    tpu.vector_store %arg7[%c0_71, %c24_72], %117 {strides = array<i32>} : memref<8x128xf32, #tpu.memory_space<vmem>>, vector<8x4xf32>,
    %c0_73 = arith.constant 0 : index
    %c28 = arith.constant 28 : index
    %119 = vector.load %arg6[%c0_73, %c28] : memref<8x128xf32, #tpu.memory_space<vmem>>, vector<8x4xf32>
    %c0_74 = arith.constant 0 : index
    %c60 = arith.constant 60 : index
    %120 = vector.load %arg6[%c0_74, %c60] : memref<8x128xf32, #tpu.memory_space<vmem>>, vector<8x4xf32>
    %c0_75 = arith.constant 0 : index
    %c92 = arith.constant 92 : index
    %121 = vector.load %arg6[%c0_75, %c92] : memref<8x128xf32, #tpu.memory_space<vmem>>, vector<8x4xf32>
    %cst_76 = arith.constant dense<0.000000e+00> : vector<8x8xf32>
    %122 = tpu.matmul %119, %120, %cst_76 {dimension_numbers = #tpu.dot_dimension_numbers<[1], [1], [0], [0], [0, 0, 1, 0], [], []>} : vector<8x4xf32>, vector<8x4xf32>, vector<8x8xf32> -> vector<8x8xf32>
    %cst_77 = arith.constant dense<0xFF800000> : vector<8xf32>
    %123 = vector.multi_reduction <maximumf>, %122, %cst_77 [1] : vector<8x8xf32> to vector<8xf32>
    %124 = vector.shape_cast %123 : vector<8xf32> to vector<8x1xf32>
    %125 = vector.broadcast %124 : vector<8x1xf32> to vector<8x8xf32>
    %126 = arith.subf %122, %125 : vector<8x8xf32>
    %127 = math.exp %126 : vector<8x8xf32>
    %cst_78 = arith.constant dense<0.000000e+00> : vector<8xf32>
    %128 = vector.multi_reduction <add>, %127, %cst_78 [1] : vector<8x8xf32> to vector<8xf32>
    %129 = vector.shape_cast %128 : vector<8xf32> to vector<8x1xf32>
    %cst_79 = arith.constant dense<0.000000e+00> : vector<8x4xf32>
    %130 = tpu.matmul %127, %121, %cst_79 {dimension_numbers = #tpu.dot_dimension_numbers<[1], [0], [0], [1], [0, 0, 1, 1], [], []>} : vector<8x8xf32>, vector<8x4xf32>, vector<8x4xf32> -> vector<8x4xf32>
    %131 = tpu.reciprocal %129 : vector<8x1xf32> -> vector<8x1xf32>
    %132 = vector.broadcast %131 : vector<8x1xf32> to vector<8x4xf32>
    %133 = arith.mulf %130, %132 : vector<8x4xf32>
    %c0_80 = arith.constant 0 : index
    %c28_81 = arith.constant 28 : index
    %134 = vector.load %arg7[%c0_80, %c28_81] : memref<8x128xf32, #tpu.memory_space<vmem>>, vector<8x4xf32>
    tpu.vector_store %arg7[%c0_80, %c28_81], %133 {strides = array<i32>} : memref<8x128xf32, #tpu.memory_space<vmem>>, vector<8x4xf32>,
    %c0_82 = arith.constant 0 : index
    %c0_83 = arith.constant 0 : index
    %135 = vector.load %arg7[%c0_82, %c0_83] : memref<8x128xf32, #tpu.memory_space<vmem>>, vector<8x128xf32>
    %c0_84 = arith.constant 0 : index
    %c0_85 = arith.constant 0 : index
    %136 = vector.load %arg3[%c0_84, %c0_85] : memref<128x128xf32, #tpu.memory_space<vmem>>, vector<128x128xf32>
    %cst_86 = arith.constant dense<0.000000e+00> : vector<8x128xf32>
    %137 = tpu.matmul %135, %136, %cst_86 {dimension_numbers = #tpu.dot_dimension_numbers<[1], [0], [0], [1], [0, 0, 1, 1], [], []>} : vector<8x128xf32>, vector<128x128xf32>, vector<8x128xf32> -> vector<8x128xf32>
    %c0_87 = arith.constant 0 : index
    %c0_88 = arith.constant 0 : index
    %138 = vector.load %arg4[%c0_87, %c0_88] : memref<1x128xf32, #tpu.memory_space<vmem>>, vector<1x128xf32>
    %139 = vector.broadcast %138 : vector<1x128xf32> to vector<8x128xf32>
    %140 = arith.addf %137, %139 : vector<8x128xf32>
    %c0_89 = arith.constant 0 : index
    %c0_90 = arith.constant 0 : index
    %c0_91 = arith.constant 0 : index
    %141 = vector.load %arg5[%c0_89, %c0_90, %c0_91] : memref<1x8x128xf32, #tpu.memory_space<vmem>>, vector<1x8x128xf32>
    %142 = vector.shape_cast %141 : vector<1x8x128xf32> to vector<8x128xf32>
    %143 = vector.shape_cast %140 : vector<8x128xf32> to vector<1x8x128xf32>
    tpu.vector_store %arg5[%c0_89, %c0_90, %c0_91], %143 {strides = array<i32>} : memref<1x8x128xf32, #tpu.memory_space<vmem>>, vector<1x8x128xf32>,
    return
  }
  func.func @transform_0(%arg0: i32) -> (i32, i32, i32) {
    %c0_i32 = arith.constant 0 : i32
    %c0_i32_0 = arith.constant 0 : i32
    %c0_i32_1 = arith.constant 0 : i32
    return %arg0, %c0_i32, %c0_i32_0 : i32, i32, i32
  }
  func.func @transform_1(%arg0: i32) -> (i32, i32) {
    %c0_i32 = arith.constant 0 : i32
    %c0_i32_0 = arith.constant 0 : i32
    %c0_i32_1 = arith.constant 0 : i32
    return %c0_i32, %c0_i32_0 : i32, i32
  }
  func.func @transform_2(%arg0: i32) -> (i32, i32) {
    %c0_i32 = arith.constant 0 : i32
    %c0_i32_0 = arith.constant 0 : i32
    %c0_i32_1 = arith.constant 0 : i32
    return %c0_i32, %c0_i32_0 : i32, i32
  }
  func.func @transform_3(%arg0: i32) -> (i32, i32) {
    %c0_i32 = arith.constant 0 : i32
    %c0_i32_0 = arith.constant 0 : i32
    %c0_i32_1 = arith.constant 0 : i32
    return %c0_i32, %c0_i32_0 : i32, i32
  }
  func.func @transform_4(%arg0: i32) -> (i32, i32, i32) {
    %c0_i32 = arith.constant 0 : i32
    %c0_i32_0 = arith.constant 0 : i32
    %c0_i32_1 = arith.constant 0 : i32
    return %arg0, %c0_i32, %c0_i32_0 : i32, i32, i32
  }
}

</mosaic_0001>

<bundles_post_ra>
// kernel: tpu_custom_call.1
= control target key start
LH: loop header
LB: loop body
LE: loop exit
PB: predicated region body
PF: predicated region fallthrough
CT: control target
= control target key end

     0   :  { %9 = vsyncpa [#allocation5], 0  ;;  %s2982_s0 = inlined_call_operand.hbm [shape: f32[2,8,128], index: 0, kind: input, shape index: {}]   ;;  %s2983_s1 = inlined_call_operand.hbm [shape: f32[128,128], index: 1, kind: input, shape index: {}]   ;;  %s2984_s2 = inlined_call_operand.hbm [shape: f32[128,128], index: 2, kind: input, shape index: {}]   ;;  %s2985_s3 = inlined_call_operand.vmem [shape: f32[1,128], index: 3, kind: input, shape index: {}]   ;;  %s2986_s4 = inlined_call_operand.hbm [shape: f32[2,8,128], index: 4, kind: output, shape index: {}]  }
   0x1   :  { %11 = vsyncpa [#allocation5 + $0x1], 0 }
   0x2   :  { %12 = vsyncpa [#allocation8], 0 }
   0x3   :  { %13 = vsyncpa [#allocation6], 0 }
   0x4   :  { %15 = vsyncpa [#allocation6 + $0x1], 0  ;;  %s2569_s15 = smov 0   ;;  %s2571_s16 = smov 0  }
   0x5   :  { %s2573_s17 = smov 0   ;;  %s2575_s18 = smov 0  }
   0x6 LB: > { %s2590_s19 = sadd.s32 4294967295, %s2503_s18   ;;  %s1908_s20 = sadd.s32 4294967294, %s2503_s18   ;;  %s2503_s18 = sphi %s2575_s18, %s3006_s18   ;;  %s2499_s17 = sphi %s2573_s17, %s3005_s17   ;;  %s2495_s16 = sphi %s2571_s16, %s3004_s16   ;;  %s2491_s15 = sphi %s2569_s15, %s3003_s15  }
   0x7   : > { %p41_p0 = scmp.ne.s32.totalorder %s2495_s16, %s2491_s15  ;;  %p2987_p1 = scmp.eq.s32.totalorder %s2590_s19, 0 }
   0x8   : > { %p134_p3 = scmp.eq.s32.totalorder %s1908_s20, 1  ;;  %p1909_p5 = scmp.ge.s32.totalorder %s2503_s18, 1 }
   0x9   : > { %p2599_p4 = por %p2987_p1, %p41_p0  ;;  %p141_p7 = scmp.lt.s32.totalorder %s2503_s18, 3 }
   0xa   : > { %p2604_p6 = por %p134_p3, %p41_p0  ;;  %s2505_s24 = smov [#allocation7]  }
   0xb   : > { %s2990_s21 = scalar_select %p2599_p4, 1, 0 }
   0xc   : > { %s2991_s22 = scalar_select %p2604_p6, 1, 0 }
   0xd   : > { %p2609_p8 = pnand %p1909_p5, %p141_p7  ;;  %s153_s25 = sshll.u32 %s2505_s24, 4  ;;  %s2613_s25 = int_to_ptr.vmem [resolvable:$true] %s153_s25 }
   0xe   : > { %s2506_s27 = smov [#allocation9]   ;;  %s2347_s5 = scalar_lea.hbm %s2983_s1, 2048 }
   0xf   : > { %p2225_p9 = pneg %p2609_p8  ;;  %s166_s28 = sshll.u32 %s2506_s27, 4  ;;  %s2624_s28 = int_to_ptr.vmem [resolvable:$true] %s166_s28 }
  0x10   : > { %p2348_p12 = scmp.ne.s32.totalorder %s2983_s1, %s2347_s5  ;;  %p2354_p5 = scmp.lt.u32.totalorder %s2347_s5, %s2983_s1 }
  0x11   : > { %p2620_p11 = pnand %p2225_p9, %p2987_p1 }
  0x13   : > { %p2349_p13 = pneg %p2620_p11 }
  0x15   : > { %p2350_p0 = pnand %p2349_p13, %p2348_p12 }
  0x17   : > { %p2351_p3 = pneg %p2350_p0 }
  0x19   : > { %p2356_p7 = pnand %p2354_p5, %p2351_p3 }
  0x1b   : > { %2359 = shalt.err (!%p2356_p7)
}
  0x1c   : > { %s2360_s10 = scalar_lea.vmem %s2613_s25, 2048  ;;  %p2368_p2 = scmp.lt.s32.totalorder %s2613_s25, %s2613_s25 }
  0x1d   : > { %p2361_p9 = scmp.ne.s32.totalorder %s2613_s25, %s2360_s10  ;;  %p2369_p12 = scmp.lt.s32.totalorder %s2360_s10, %s2360_s10 }
  0x1f   : > { %p2363_p10 = pnand %p2361_p9, %p2349_p13  ;;  %p2370_p0 = por %p2369_p12, %p2368_p2 }
  0x21   : > { %p2364_p1 = pneg %p2363_p10 }
  0x23   : > { %p2371_p6 = pnand %p2370_p0, %p2364_p1 }
  0x25   : > { %2374 = shalt.err (!%p2371_p6)
}
  0x26   : > { %s2507_s11 = smov 128   ;;  %s2508_s12 = smov 8  }
  0x27   : > { %2228 = dma.hbm_to_vmem [thread:$0]  (!%p2620_p11), %s2983_s1, 2048, %s2613_s25, [#allocation8], %s2507_s11, %s2507_s11, %s2508_s12  }
  0x28   : > { %s2375_s27 = scalar_lea.hbm %s2984_s2, 2048 }
  0x29   : > { %p2376_p2 = scmp.ne.s32.totalorder %s2984_s2, %s2375_s27  ;;  %p2382_p10 = scmp.lt.u32.totalorder %s2375_s27, %s2984_s2 }
  0x2b   : > { %p2378_p1 = pnand %p2376_p2, %p2349_p13 }
  0x2d   : > { %p2379_p6 = pneg %p2378_p1 }
  0x2f   : > { %p2384_p3 = pnand %p2382_p10, %p2379_p6 }
  0x31   : > { %2387 = shalt.err (!%p2384_p3)
}
  0x32   : > { %s2388_s25 = scalar_lea.vmem %s2624_s28, 2048  ;;  %p2396_p12 = scmp.lt.s32.totalorder %s2624_s28, %s2624_s28 }
  0x33   : > { %p2389_p5 = scmp.ne.s32.totalorder %s2624_s28, %s2388_s25  ;;  %p2397_p0 = scmp.lt.s32.totalorder %s2388_s25, %s2388_s25 }
  0x35   : > { %p2391_p7 = pnand %p2389_p5, %p2349_p13  ;;  %p2398_p2 = por %p2397_p0, %p2396_p12 }
  0x37   : > { %p2392_p9 = pneg %p2391_p7 }
  0x39   : > { %p2399_p1 = pnand %p2398_p2, %p2392_p9 }
  0x3b   : > { %2402 = shalt.err (!%p2399_p1)
}
  0x3c   : > { %2231 = dma.hbm_to_vmem [thread:$0]  (!%p2620_p11), %s2984_s2, 2048, %s2624_s28, [#allocation8], %s2507_s11, %s2507_s11, %s2508_s12  }
  0x3d   : > { %s2679_s9 = sadd.s32 1, %s2503_s18   ;;  %s28_s26 = sadd.s32 1, %s2499_s17 }
  0x3e   : > { %s25_s10 = ssub.s32 %s2503_s18, %s2679_s9  ;;  %p35_p13 = scmp.ne.s32.totalorder %s2499_s17, %s2495_s16 }
  0x3f   : > { %p26_p6 = scmp.eq.s32.totalorder %s25_s10, 0  ;;  %p36_p10 = scmp.eq.s32.totalorder %s2503_s18, 0 }
  0x40   : > { %p2994_p3 = scmp.eq.s32.totalorder %s2590_s19, 1  ;;  %p2242_p7 = scmp.lt.s32.totalorder %s2503_s18, 2 }
  0x41   : > { %s2695_s14 = scalar_select %p26_p6, %s2499_s17, %s28_s26  }
  0x42   : > { %p2689_p5 = por %p2994_p3, %p35_p13  ;;  %p37_p9 = por %p36_p10, %p35_p13 }
  0x43   : > { %s183_s20 = sand.u32 1, %s2499_s17   ;;  %s1914_s28 = sshll.u32 %s2503_s18, 7 }
  0x44   : > { %s2995_s13 = scalar_select %p2689_p5, 1, 0 }
  0x45   : > { %s1913_s24 = sshll.u32 %s183_s20, 3  ;;  %s2702_s27 = scalar_lea.hbm %s2982_s0, %s1914_s28 }
  0x46   : > { %s187_s29 = scalar_lea.vmem [#allocation4], %s1913_s24  ;;  %p2706_p11 = pnand %p2242_p7, %p37_p9 }
  0x47   : > { %s194_s30 = sshll.u32 %s187_s29, 4  ;;  %s184_s6 = scalar_lea.sflag [#allocation5], %s183_s20  ;;  %s2704_s30 = int_to_ptr.vmem [resolvable:$true] %s194_s30 }
  0x48   : > { %s2403_s25 = scalar_lea.hbm %s2702_s27, 128  ;;  %p2405_p0 = pneg %p2706_p11 }
  0x49   : > { %p2404_p12 = scmp.ne.s32.totalorder %s2702_s27, %s2403_s25  ;;  %s2408_s26 = scalar_lea.hbm %s2982_s0, 256 }
  0x4a   : > { %p2409_p13 = scmp.lt.u32.totalorder %s2702_s27, %s2982_s0  ;;  %p2410_p6 = scmp.lt.u32.totalorder %s2408_s26, %s2403_s25 }
  0x4b   : > { %p2406_p2 = pnand %p2405_p0, %p2404_p12  ;;  %p2412_p3 = scmp.lt.u32.totalorder %s2403_s25, %s2702_s27 }
  0x4c   : > { %p2411_p10 = por %p2410_p6, %p2409_p13 }
  0x4d   : > { %p2407_p1 = pneg %p2406_p2 }
  0x4e   : > { %p2413_p7 = por %p2412_p3, %p2411_p10 }
  0x50   : > { %p2414_p9 = pnand %p2413_p7, %p2407_p1 }
  0x52   : > { %2417 = shalt.err (!%p2414_p9)
}
  0x53   : > { %s2418_s20 = scalar_lea.vmem %s2704_s30, 128  ;;  %s2509_s28 = smov [#allocation4]  }
  0x54   : > { %p2419_p12 = scmp.ne.s32.totalorder %s2704_s30, %s2418_s20  ;;  %s2423_s11 = sshll.u32 %s2509_s28, 4  ;;  %s2424_s11 = int_to_ptr.vmem [resolvable:$false] %s2423_s11 }
  0x55   : > { %s2425_s12 = scalar_lea.vmem %s2424_s11, 256  ;;  %p2426_p4 = scmp.lt.s32.totalorder %s2704_s30, %s2424_s11 }
  0x56   : > { %p2421_p2 = pnand %p2419_p12, %p2405_p0  ;;  %p2427_p13 = scmp.lt.s32.totalorder %s2425_s12, %s2418_s20 }
  0x58   : > { %p2422_p5 = pneg %p2421_p2  ;;  %p2428_p6 = por %p2427_p13, %p2426_p4 }
  0x5a   : > { %p2429_p10 = pnand %p2428_p6, %p2422_p5 }
  0x5c   : > { %2432 = shalt.err (!%p2429_p10)
}
  0x5d   : > { %2235 = dma.hbm_to_vmem [thread:$0]  (!%p2706_p11), %s2702_s27, 128, %s2704_s30, %s184_s6  }
  0x5e   : > { %203 = sbr.rel (%p2609_p8) target bundleno = 4022 (0xfb6), region = 36  ;;  %s2738_s29 = sand.u32 (!%p2609_p8), 1, %s2495_s16  }
  0x5f   : > { %s1916_s25 = sshll.u32 (!%p2609_p8), %s2738_s29, 3  ;;  %s206_s7 = scalar_lea.sflag (!%p2609_p8), [#allocation5], %s2738_s29 }
  0x60   : > { %s2744_s8 = scalar_lea.vmem (!%p2609_p8), [#allocation4], %s1916_s25  ;;  %p2997_p4 = scmp.ne.s32.totalorder (!%p2609_p8), %s2990_s21, 0 }
  0x65   : > { %2478 = dma.done.wait (%p2997_p4), %s206_s7, 128  }
  0x66   : > { %2480 = vsyncadd (%p2997_p4), %s206_s7, 4294967168  ;;  %p2998_p5 = scmp.eq.s32.totalorder %s2590_s19, 0 }
  0x68   : > { %2482 = dma.done.wait (%p2998_p5), [#allocation8], 4096   ;;  %p2999_p8 = pmov %p2998_p5 }
  0x69   : > { %v2510_v0 = vmov 0.0|0.0   ;;  %vm2511_vm0 = vmmov 0   ;;  %v2512_v1 = vmov 0.0   ;;  %v243_v2 = vld [vmem:[#allocation7] sm:$0xff]  ;;  %v244_v3 = vld [vmem:[#allocation7 + $0x8] sm:$0xff]  ;;  %v245_v4 = vld [vmem:[#allocation7 + $0x10] sm:$0xff] }
  0x6a   : > { %2484 = vsyncadd (%p2999_p8), [#allocation8], 4294963200  ;;  %2165 = vmatprep.subr.bf16.mxu0 %v2510_v0  ;;  %2047 = vmatprep.mubr.msk.f32.mxu0 %vm2511_vm0, %v2512_v1  ;;  %330 = vst [vmem:[#allocation3] sm:$0xff] %v2512_v1  ;;  %v2166_v5 = vpack.c.bf16 %v244_v3, %v243_v2  ;;  %v246_v6 = vld [vmem:[#allocation7 + $0x18] sm:$0xff]  ;;  %v247_v8 = vld [vmem:[#allocation7 + $0x20] sm:$0xff]  ;;  %s2513_s21 = smov 64  }
  0x6b   : > { %2050 = vmatprep.subr.mxu1 %v2512_v1  ;;  %2052 = vmatprep.mubr.msk.f32.mxu1 %vm2511_vm0, %v2512_v1  ;;  %v2169_v7 = vpack.c.bf16 %v246_v6, %v245_v4  ;;  %v248_v9 = vld [vmem:[#allocation7 + $0x28] sm:$0xff]  ;;  %v249_v11 = vld [vmem:[#allocation7 + $0x30] sm:$0xff]  ;;  %v250_v12 = vld [vmem:[#allocation7 + $0x38] sm:$0xff]  ;;  %s2514_s23 = smov 96   ;;  %s2515_s27 = smov 92   ;;  %vm335_vm1 = vcmask 31744  }
  0x6c   : > { %2167 = vmatpush3.bf16.msra.mxu0 %v2166_v5  ;;  %v2172_v10 = vpack.c.bf16 %v248_v9, %v247_v8  ;;  %v2175_v13 = vpack.c.bf16 %v250_v12, %v249_v11  ;;  %v251_v14 = vld [vmem:[#allocation7 + $0x40] sm:$0xff]  ;;  %v252_v15 = vld [vmem:[#allocation7 + $0x48] sm:$0xff]  ;;  %v253_v17 = vld [vmem:[#allocation7 + $0x50] sm:$0xff]  ;;  %s2516_s30 = smov 124   ;;  %vm410_vm2 = vcmask 64512   ;;  %s2517_s5 = smov 60  }
  0x6d   : > { %2168 = vmatprep.subr.bf16.mxu0 %v2510_v0  ;;  %v2178_v16 = vpack.c.bf16 %v252_v15, %v251_v14  ;;  %v254_v18 = vld [vmem:[#allocation7 + $0x58] sm:$0xff]  ;;  %v255_v20 = vld [vmem:[#allocation7 + $0x60] sm:$0xff]  ;;  %v256_v21 = vld [vmem:[#allocation7 + $0x68] sm:$0xff]  ;;  %s2518_s6 = smov 120   ;;  %s2519_s26 = smov 88   ;;  %vm670_vm3 = vcmask 64544  }
  0x6e   : > { %v2181_v19 = vpack.c.bf16 %v254_v18, %v253_v17  ;;  %v2184_v22 = vpack.c.bf16 %v256_v21, %v255_v20  ;;  %v257_v23 = vld [vmem:[#allocation7 + $0x70] sm:$0xff]  ;;  %v258_v24 = vld [vmem:[#allocation7 + $0x78] sm:$0xff]  ;;  %s2520_s10 = smov 56   ;;  %s2521_s24 = smov 84   ;;  %vm843_vm4 = vcmask 97344   ;;  %vm1016_vm5 = vcmask 130144  }
  0x6f   : > { %v2187_v25 = vpack.c.bf16 %v258_v24, %v257_v23  ;;  %v242_v26 = vld [vmem:[%s2744_s8] sm:$0xff]  ;;  %s2522_s20 = smov 116   ;;  %s2523_s28 = smov 52   ;;  %vm1189_vm6 = vcmask 162944   ;;  %vm1362_vm7 = vcmask 195744   ;;  %vm1535_vm8 = vcmask 228544  }
  0x70   : > { %2170 = vmatpush3.bf16.msra.mxu0 %v2169_v7  ;;  %s2524_s11 = smov 112   ;;  %s2525_s12 = smov 80   ;;  %vm1708_vm9 = vcmask 261344  }
  0x71   : > { %2171 = vmatprep.subr.bf16.mxu0 %v2510_v0  ;;  %s2526_s7 = smov 48   ;;  %s2527_s8 = smov 76  }
  0x72   : > { %p3000_p0 = scmp.ne.s32.totalorder %s2995_s13, 0 }
  0x74   : > { %2173 = vmatpush3.bf16.msra.mxu0 %v2172_v10 }
  0x75   : > { %2174 = vmatprep.subr.bf16.mxu0 %v2510_v0 }
  0x78   : > { %2176 = vmatpush3.bf16.msra.mxu0 %v2175_v13 }
  0x79   : > { %2177 = vmatprep.subr.bf16.mxu0 %v2510_v0 }
  0x7c   : > { %2179 = vmatpush3.bf16.msra.mxu0 %v2178_v16 }
  0x7d   : > { %2180 = vmatprep.subr.bf16.mxu0 %v2510_v0 }
  0x80   : > { %2182 = vmatpush3.bf16.msra.mxu0 %v2181_v19 }
  0x81   : > { %2183 = vmatprep.subr.bf16.mxu0 %v2510_v0 }
  0x84   : > { %2185 = vmatpush3.bf16.msra.mxu0 %v2184_v22 }
  0x85   : > { %2186 = vmatprep.subr.bf16.mxu0 %v2510_v0 }
  0x88   : > { %2188 = vmatpush3.bf16.msra.mxu0 %v2187_v25 }
  0x89   : > { %2189 = vmatprep.subr.bf16.mxu0 %v2510_v0 }
  0x8b   : > { %2048 = vmatmul.mubr.f32.vlgmr.msra.gmra.mrb[0].mxu0 %v242_v26 }
  0x8c   : > { %2162 = vmatprep.mubr.msk.f32.mxu0 %vm2511_vm0, %v2512_v1 }
 0x15e   : > { %v2772_v27 = vpop.f32.mrb[0].mxu0 }
 0x15f   : > { %420 = vrot.lane.b32.xlu1 %v2772_v27, %s2513_s21  ;;  %333 = vrot.lane.b32.xlu0 %v2772_v27, %s2514_s23  ;;  %v2049_v28 = vpop.f32.mrb[1].mxu0  ;;  %s2528_s21 = smov 108   ;;  %s2529_s23 = smov 44  }
 0x163   : > { %503 = vrot.lane.b32.xlu1 %v2772_v27, %s2515_s27  ;;  %s2530_s27 = smov 72  }
 0x167   : > { %501 = vrot.lane.b32.xlu1 %v2772_v27, %s2516_s30  ;;  %s2531_s30 = smov 104  }
 0x1d1   : > { %v334_v29 = vpop.permute.xlu0 %333  ;;  %v421_v30 = vpop.permute.xlu1 %420 }
 0x1d2   : > { %2051 = vmatpush3.xpose.msk.msra.mxu1 %vm335_vm1, %v334_v29 }
 0x1d3   : > { %2055 = vmatprep.subr.mxu1 %v2512_v1 }
 0x1d5   : > { %2053 = vmatmul.mubr.msk.f32.vlgmr.msra.gmra.mrb[0].mxu1 %vm335_vm1, %v2772_v27  ;;  %v504_v37 = vpop.permute.xlu1 %503 }
 0x1d6   : > { %2056 = vmatpush3.msra.mxu1 %v421_v30  ;;  %2057 = vmatprep.mubr.msk.f32.mxu1 %vm2511_vm0, %v2512_v1 }
 0x1d7   : > { %2060 = vmatprep.subr.mxu1 %v2512_v1 }
 0x1d9   : > { %v502_v39 = vpop.permute.xlu1 %501 }
 0x2a8   : > { %v406_v31 = vpop.f32.mrb[0].mxu1 }
 0x2a9   : > { %v2054_v32 = vpop.f32.mrb[1].mxu1  ;;  %v411_v33 = vsel %vm410_vm2, %v406_v31, -inf }
 0x2aa   : > { %412 = vmax.xlane.f32.xlu0 %v411_v33 }
 0x2c0   : > { %588 = vrot.lane.b32.xlu0 %v2772_v27, %s2517_s5  ;;  %s2532_s5 = smov 40  }
 0x2c4   : > { %674 = vrot.lane.b32.xlu0 %v2772_v27, %s2518_s6  ;;  %s2533_s6 = smov 100  }
 0x337   : > { %v413_v34 = vpop.xlane.xlu0 %412 }
 0x338   : > { %v414_v35 = vsub.f32 %v406_v31, %v413_v34 }
 0x33a   : > { %v415_v36 = vmul.f32 1.442695, %v414_v35 }
 0x33b   : > { %v589_v40 = vpop.permute.xlu0 %588 }
 0x33c   : > { %2315 = vpow2.f32 %v415_v36 }
 0x33f   : > { %v675_v51 = vpop.permute.xlu0 %674 }
 0x346   : > { %v2788_v38 = vpop.eup %2315 }
 0x347   : > { %2058 = vmatmul.mubr.msk.f32.vlgmr.msra.gmra.mrb[2].mxu1 %vm410_vm2, %v2788_v38 }
 0x348   : > { %2061 = vmatpush3.xpose.msk.msra.mxu1 %vm335_vm1, %v504_v37  ;;  %2062 = vmatprep.mubr.msk.f32.mxu1 %vm2511_vm0, %v2512_v1 }
 0x349   : > { %2065 = vmatprep.subr.mxu1 %v2512_v1 }
 0x34b   : > { %2063 = vmatmul.mubr.msk.f32.vlgmr.msra.gmra.mrb[4].mxu1 %vm335_vm1, %v502_v39 }
 0x34c   : > { %2066 = vmatpush3.msra.mxu1 %v589_v40  ;;  %2067 = vmatprep.mubr.msk.f32.mxu1 %vm2511_vm0, %v2512_v1 }
 0x34d   : > { %2070 = vmatprep.subr.mxu1 %v2512_v1 }
 0x41a   : > { %v2800_v41 = vpop.f32.mrb[2].mxu1 }
 0x41b   : > { %v2059_v42 = vpop.f32.mrb[3].mxu1 }
 0x41e   : > { %v575_v43 = vpop.f32.mrb[4].mxu1 }
 0x41f   : > { %v2064_v44 = vpop.f32.mrb[5].mxu1  ;;  %v579_v45 = vsel %vm410_vm2, %v575_v43, -inf }
 0x420   : > { %580 = vmax.xlane.f32.xlu1 %v579_v45 }
 0x431   : > { %676 = vrot.lane.b32.xlu1 %v2772_v27, %s2519_s26  ;;  %s2534_s26 = smov 68  }
 0x435   : > { %761 = vrot.lane.b32.xlu1 %v2772_v27, %s2520_s10  ;;  %s2535_s10 = smov 36  }
 0x439   : > { %849 = vrot.lane.b32.xlu1 %v2772_v27, %s2521_s24  ;;  %s2536_s24 = smov 8  }
 0x43d   : > { %847 = vrot.lane.b32.xlu1 %v2772_v27, %s2522_s20  ;;  %s2537_s20 = smov 12  }
 0x4ad   : > { %v581_v46 = vpop.xlane.xlu1 %580 }
 0x4ae   : > { %v582_v47 = vsub.f32 %v575_v43, %v581_v46 }
 0x4b0   : > { %v583_v48 = vmul.f32 1.442695, %v582_v47 }
 0x4b1   : > { %v677_v49 = vpop.permute.xlu1 %676 }
 0x4b2   : > { %2317 = vpow2.f32 %v583_v48  ;;  %v417_v48 = vsel %vm410_vm2, %v2788_v38, 0.0 }
 0x4b5   : > { %v762_v52 = vpop.permute.xlu1 %761 }
 0x4b9   : > { %v850_v61 = vpop.permute.xlu1 %849 }
 0x4bc   : > { %v2807_v50 = vpop.eup %2317 }
 0x4bd   : > { %2068 = vmatmul.mubr.msk.f32.vlgmr.msra.gmra.mrb[6].mxu1 %vm410_vm2, %v2807_v50  ;;  %v848_v63 = vpop.permute.xlu1 %847  ;;  %v585_v47 = vsel %vm410_vm2, %v2807_v50, 0.0 }
 0x4be   : > { %2071 = vmatpush3.xpose.msk.msra.mxu1 %vm335_vm1, %v677_v49  ;;  %2072 = vmatprep.mubr.msk.f32.mxu1 %vm2511_vm0, %v2512_v1 }
 0x4bf   : > { %2075 = vmatprep.subr.mxu1 %v2512_v1 }
 0x4c1   : > { %2073 = vmatmul.mubr.msk.f32.vlgmr.msra.gmra.mrb[8].mxu1 %vm335_vm1, %v675_v51 }
 0x4c2   : > { %2076 = vmatpush3.msra.mxu1 %v762_v52  ;;  %2077 = vmatprep.mubr.msk.f32.mxu1 %vm2511_vm0, %v2512_v1 }
 0x4c3   : > { %2080 = vmatprep.subr.mxu1 %v2512_v1 }
 0x590   : > { %v2819_v53 = vpop.f32.mrb[6].mxu1 }
 0x591   : > { %v2069_v54 = vpop.f32.mrb[7].mxu1 }
 0x594   : > { %v748_v55 = vpop.f32.mrb[8].mxu1 }
 0x595   : > { %v2074_v56 = vpop.f32.mrb[9].mxu1  ;;  %v752_v57 = vsel %vm410_vm2, %v748_v55, -inf }
 0x596   : > { %753 = vmax.xlane.f32.xlu0 %v752_v57 }
 0x5ac   : > { %934 = vrot.lane.b32.xlu0 %v2772_v27, %s2523_s28  ;;  %s2538_s28 = smov 20  }
 0x5b0   : > { %1020 = vrot.lane.b32.xlu0 %v2772_v27, %s2524_s11  ;;  %s2539_s11 = smov 4  }
 0x623   : > { %v754_v58 = vpop.xlane.xlu0 %753 }
 0x624   : > { %v755_v59 = vsub.f32 %v748_v55, %v754_v58 }
 0x626   : > { %v756_v60 = vmul.f32 1.442695, %v755_v59 }
 0x627   : > { %v935_v2 = vpop.permute.xlu0 %934 }
 0x628   : > { %2319 = vpow2.f32 %v756_v60 }
 0x62b   : > { %v1021_v13 = vpop.permute.xlu0 %1020 }
 0x632   : > { %v2824_v62 = vpop.eup %2319 }
 0x633   : > { %2078 = vmatmul.mubr.msk.f32.vlgmr.msra.gmra.mrb[10].mxu1 %vm410_vm2, %v2824_v62 }
 0x634   : > { %2081 = vmatpush3.xpose.msk.msra.mxu1 %vm335_vm1, %v850_v61  ;;  %2082 = vmatprep.mubr.msk.f32.mxu1 %vm2511_vm0, %v2512_v1 }
 0x635   : > { %2085 = vmatprep.subr.mxu1 %v2512_v1 }
 0x637   : > { %2083 = vmatmul.mubr.msk.f32.vlgmr.msra.gmra.mrb[12].mxu1 %vm335_vm1, %v848_v63 }
 0x638   : > { %2086 = vmatpush3.msra.mxu1 %v935_v2  ;;  %2087 = vmatprep.mubr.msk.f32.mxu1 %vm2511_vm0, %v2512_v1 }
 0x639   : > { %2090 = vmatprep.subr.mxu1 %v2512_v1 }
 0x706   : > { %v2836_v3 = vpop.f32.mrb[10].mxu1 }
 0x707   : > { %v2079_v4 = vpop.f32.mrb[11].mxu1 }
 0x70a   : > { %v921_v5 = vpop.f32.mrb[12].mxu1 }
 0x70b   : > { %v2084_v6 = vpop.f32.mrb[13].mxu1  ;;  %v925_v7 = vsel %vm410_vm2, %v921_v5, -inf }
 0x70c   : > { %926 = vmax.xlane.f32.xlu1 %v925_v7 }
 0x71d   : > { %1022 = vrot.lane.b32.xlu1 %v2772_v27, %s2525_s12  ;;  %s2540_s12 = smov 16  }
 0x721   : > { %1107 = vrot.lane.b32.xlu1 %v2772_v27, %s2526_s7  ;;  %s2541_s7 = smov 24  }
 0x725   : > { %1195 = vrot.lane.b32.xlu1 %v2772_v27, %s2527_s8  ;;  %s2542_s8 = smov 28  }
 0x729   : > { %1193 = vrot.lane.b32.xlu1 %v2772_v27, %s2528_s21 }
 0x799   : > { %v927_v8 = vpop.xlane.xlu1 %926 }
 0x79a   : > { %v928_v9 = vsub.f32 %v921_v5, %v927_v8 }
 0x79c   : > { %v929_v10 = vmul.f32 1.442695, %v928_v9 }
 0x79d   : > { %v1023_v11 = vpop.permute.xlu1 %1022 }
 0x79e   : > { %2321 = vpow2.f32 %v929_v10 }
 0x7a1   : > { %v1108_v14 = vpop.permute.xlu1 %1107 }
 0x7a5   : > { %v1196_v23 = vpop.permute.xlu1 %1195 }
 0x7a8   : > { %v2843_v12 = vpop.eup %2321 }
 0x7a9   : > { %2088 = vmatmul.mubr.msk.f32.vlgmr.msra.gmra.mrb[14].mxu1 %vm410_vm2, %v2843_v12  ;;  %v1194_v25 = vpop.permute.xlu1 %1193  ;;  %v931_v6 = vsel %vm410_vm2, %v2843_v12, 0.0 }
 0x7aa   : > { %2091 = vmatpush3.xpose.msk.msra.mxu1 %vm335_vm1, %v1023_v11  ;;  %2092 = vmatprep.mubr.msk.f32.mxu1 %vm2511_vm0, %v2512_v1 }
 0x7ab   : > { %2095 = vmatprep.subr.mxu1 %v2512_v1 }
 0x7ad   : > { %2093 = vmatmul.mubr.msk.f32.vlgmr.msra.gmra.mrb[16].mxu1 %vm335_vm1, %v1021_v13 }
 0x7ae   : > { %2096 = vmatpush3.msra.mxu1 %v1108_v14  ;;  %2097 = vmatprep.mubr.msk.f32.mxu1 %vm2511_vm0, %v2512_v1 }
 0x7af   : > { %2100 = vmatprep.subr.mxu1 %v2512_v1 }
 0x87c   : > { %v2855_v15 = vpop.f32.mrb[14].mxu1 }
 0x87d   : > { %v2089_v16 = vpop.f32.mrb[15].mxu1 }
 0x880   : > { %v1094_v17 = vpop.f32.mrb[16].mxu1 }
 0x881   : > { %v2094_v18 = vpop.f32.mrb[17].mxu1  ;;  %v1098_v19 = vsel %vm410_vm2, %v1094_v17, -inf }
 0x882   : > { %1099 = vmax.xlane.f32.xlu0 %v1098_v19 }
 0x898   : > { %1280 = vrot.lane.b32.xlu0 %v2772_v27, %s2529_s23 }
 0x89c   : > { %1368 = vrot.lane.b32.xlu0 %v2772_v27, %s2530_s27  ;;  %s1946_s27 = sshll.u32 %s2590_s19, 7  ;;  %s2543_s19 = smov [#allocation10]  }
 0x8a0   : > { %1366 = vrot.lane.b32.xlu0 %v2772_v27, %s2531_s30  ;;  %s241_s30 = scalar_lea.vmem [#allocation10], %s1916_s25  ;;  %s2437_s25 = sshll.u32 %s2543_s19, 4  ;;  %s2438_s25 = int_to_ptr.vmem [resolvable:$false] %s2437_s25 }
 0x8a4   : > { %1453 = vrot.lane.b32.xlu0 %v2772_v27, %s2532_s5  ;;  %s1819_s5 = sshll.u32 %s241_s30, 4  ;;  %s2940_s5 = int_to_ptr.vmem [resolvable:$true] %s1819_s5 }
 0x8a5   : > { %p2440_p7 = scmp.lt.s32.totalorder %s2940_s5, %s2438_s25 }
 0x8a8   : > { %1539 = vrot.lane.b32.xlu0 %v2772_v27, %s2533_s6 }
 0x90f   : > { %v1100_v20 = vpop.xlane.xlu0 %1099 }
 0x910   : > { %v1101_v21 = vsub.f32 %v1094_v17, %v1100_v20 }
 0x912   : > { %v1102_v22 = vmul.f32 1.442695, %v1101_v21 }
 0x913   : > { %v1281_v26 = vpop.permute.xlu0 %1280 }
 0x914   : > { %2323 = vpow2.f32 %v1102_v22 }
 0x917   : > { %v1369_v36 = vpop.permute.xlu0 %1368 }
 0x91b   : > { %v1367_v37 = vpop.permute.xlu0 %1366 }
 0x91e   : > { %v2863_v24 = vpop.eup %2323 }
 0x91f   : > { %2098 = vmatmul.mubr.msk.f32.vlgmr.msra.gmra.mrb[18].mxu1 %vm410_vm2, %v2863_v24  ;;  %v1454_v40 = vpop.permute.xlu0 %1453 }
 0x920   : > { %2101 = vmatpush3.xpose.msk.msra.mxu1 %vm335_vm1, %v1196_v23  ;;  %2102 = vmatprep.mubr.msk.f32.mxu1 %vm2511_vm0, %v2512_v1 }
 0x921   : > { %2105 = vmatprep.subr.mxu1 %v2512_v1 }
 0x923   : > { %2103 = vmatmul.mubr.msk.f32.vlgmr.msra.gmra.mrb[20].mxu1 %vm335_vm1, %v1194_v25 }
 0x924   : > { %2106 = vmatpush3.msra.mxu1 %v1281_v26  ;;  %2107 = vmatprep.mubr.msk.f32.mxu1 %vm2511_vm0, %v2512_v1 }
 0x925   : > { %2110 = vmatprep.subr.mxu1 %v2512_v1 }
 0x9f2   : > { %v2875_v28 = vpop.f32.mrb[18].mxu1 }
 0x9f3   : > { %v2099_v29 = vpop.f32.mrb[19].mxu1 }
 0x9f4   : > { %v1712_v29 = vld [vmem:[#allocation9 + $0x8] sm:$0xff] }
 0x9f6   : > { %v1267_v30 = vpop.f32.mrb[20].mxu1 }
 0x9f7   : > { %v2104_v31 = vpop.f32.mrb[21].mxu1  ;;  %v1271_v32 = vsel %vm410_vm2, %v1267_v30, -inf }
 0x9f8   : > { %1272 = vmax.xlane.f32.xlu1 %v1271_v32  ;;  %v1714_v32 = vld [vmem:[#allocation9 + $0x18] sm:$0xff] }
 0xa85   : > { %v1273_v33 = vpop.xlane.xlu1 %1272 }
 0xa86   : > { %v1274_v34 = vsub.f32 %v1267_v30, %v1273_v33  ;;  %v1713_v30 = vld [vmem:[#allocation9 + $0x10] sm:$0xff] }
 0xa87   : > { %v2193_v33 = vpack.c.bf16 %v1714_v32, %v1713_v30 }
 0xa88   : > { %v1275_v35 = vmul.f32 1.442695, %v1274_v34  ;;  %v1715_v34 = vld [vmem:[#allocation9 + $0x20] sm:$0xff] }
 0xa8a   : > { %2325 = vpow2.f32 %v1275_v35  ;;  %v1716_v35 = vld [vmem:[#allocation9 + $0x28] sm:$0xff] }
 0xa94   : > { %v2326_v39 = vpop.eup %2325 }
 0xa95   : > { %2108 = vmatmul.mubr.msk.f32.vlgmr.msra.gmra.mrb[22].mxu1 %vm410_vm2, %v2326_v39 }
 0xa96   : > { %2111 = vmatpush3.xpose.msk.msra.mxu1 %vm335_vm1, %v1369_v36  ;;  %2112 = vmatprep.mubr.msk.f32.mxu1 %vm2511_vm0, %v2512_v1  ;;  %v2196_v36 = vpack.c.bf16 %v1716_v35, %v1715_v34 }
 0xa97   : > { %2115 = vmatprep.subr.mxu1 %v2512_v1 }
 0xa99   : > { %2113 = vmatmul.mubr.msk.f32.vlgmr.msra.gmra.mrb[24].mxu1 %vm335_vm1, %v1367_v37  ;;  %v1718_v37 = vld [vmem:[#allocation9 + $0x38] sm:$0xff] }
 0xa9a   : > { %2116 = vmatpush3.msra.mxu1 %v1454_v40  ;;  %2117 = vmatprep.mubr.msk.f32.mxu1 %vm2511_vm0, %v2512_v1  ;;  %v1719_v40 = vld [vmem:[#allocation9 + $0x40] sm:$0xff] }
 0xa9b   : > { %2120 = vmatprep.subr.mxu1 %v2512_v1 }
 0xb68   : > { %v2887_v42 = vpop.f32.mrb[22].mxu1 }
 0xb69   : > { %v2109_v43 = vpop.f32.mrb[23].mxu1 }
 0xb6c   : > { %v1440_v44 = vpop.f32.mrb[24].mxu1 }
 0xb6d   : > { %v2114_v45 = vpop.f32.mrb[25].mxu1  ;;  %v1444_v46 = vsel %vm410_vm2, %v1440_v44, -inf }
 0xb6e   : > { %1445 = vmax.xlane.f32.xlu1 %v1444_v46  ;;  %v1722_v45 = vld [vmem:[#allocation9 + $0x58] sm:$0xff] }
 0xb7f   : > { %1541 = vrot.lane.b32.xlu1 %v2772_v27, %s2534_s26 }
 0xb83   : > { %1626 = vrot.lane.b32.xlu1 %v2772_v27, %s2535_s10  ;;  %v1540_v27 = vpop.permute.xlu0 %1539  ;;  %s2938_s10 = scalar_lea.hbm %s2986_s4, %s1946_s27 }
 0xba7   : > { %586 = vadd.xlane.f32.xlu1 %v585_v47 }
 0xbab   : > { %418 = vadd.xlane.f32.xlu1 %v417_v48 }
 0xbfb   : > { %v1446_v49 = vpop.xlane.xlu1 %1445 }
 0xbfc   : > { %v1447_v51 = vsub.f32 %v1440_v44, %v1446_v49  ;;  %v1721_v44 = vld [vmem:[#allocation9 + $0x50] sm:$0xff] }
 0xbfd   : > { %v2205_v46 = vpack.c.bf16 %v1722_v45, %v1721_v44 }
 0xbfe   : > { %v1448_v52 = vmul.f32 1.442695, %v1447_v51 }
 0xbff   : > { %v1542_v54 = vpop.permute.xlu1 %1541 }
 0xc00   : > { %2327 = vpow2.f32 %v1448_v52 }
 0xc03   : > { %v1627_v50 = vpop.permute.xlu1 %1626 }
 0xc0a   : > { %v2328_v55 = vpop.eup %2327 }
 0xc0b   : > { %2118 = vmatmul.mubr.msk.f32.vlgmr.msra.gmra.mrb[26].mxu1 %vm410_vm2, %v2328_v55  ;;  %v1450_v7 = vsel %vm410_vm2, %v2328_v55, 0.0 }
 0xc0c   : > { %2121 = vmatpush3.xpose.msk.msra.mxu1 %vm335_vm1, %v1542_v54  ;;  %2122 = vmatprep.mubr.msk.f32.mxu1 %vm2511_vm0, %v2512_v1 }
 0xc0d   : > { %2125 = vmatprep.subr.mxu1 %v2512_v1 }
 0xc0f   : > { %2123 = vmatmul.mubr.msk.f32.vlgmr.msra.gmra.mrb[28].mxu1 %vm335_vm1, %v1540_v27  ;;  %v1723_v27 = vld [vmem:[#allocation9 + $0x60] sm:$0xff] }
 0xc10   : > { %2126 = vmatpush3.msra.mxu1 %v1627_v50  ;;  %2127 = vmatprep.mubr.msk.f32.mxu1 %vm2511_vm0, %v2512_v1  ;;  %v758_v1 = vsel %vm410_vm2, %v2824_v62, 0.0  ;;  %v1724_v50 = vld [vmem:[#allocation9 + $0x68] sm:$0xff] }
 0xc34   : > { %v587_v38 = vpop.xlane.xlu1 %586 }
 0xc35   : > { %2329 = vrcp.f32 %v587_v38  ;;  %v2208_v38 = vpack.c.bf16 %v1724_v50, %v1723_v27 }
 0xc38   : > { %v419_v56 = vpop.xlane.xlu1 %418 }
 0xc39   : > { %2331 = vrcp.f32 %v419_v56  ;;  %v1725_v56 = vld [vmem:[#allocation9 + $0x70] sm:$0xff] }
 0xc3f   : > { %v2330_v57 = vpop.eup %2329 }
 0xc40   : > { %v665_v58 = vmul.f32 %v2330_v57, %v2819_v53  ;;  %v1277_v53 = vsel %vm410_vm2, %v2326_v39, 0.0  ;;  %v1726_v57 = vld [vmem:[#allocation9 + $0x78] sm:$0xff] }
 0xc43   : > { %v2332_v59 = vpop.eup %2331 }
 0xc44   : > { %v497_v60 = vmul.f32 %v2332_v59, %v2800_v41  ;;  %v1104_v41 = vsel %vm410_vm2, %v2863_v24, 0.0 }
 0xc46   : > { %498 = vst.msk [vmem:[#allocation3] sm:$0xff] %vm335_vm1, %v497_v60 }
 0xcde   : > { %v1525_v61 = vpop.f32.mrb[26].mxu1 }
 0xcdf   : > { %v2119_v63 = vpop.f32.mrb[27].mxu1 }
 0xce2   : > { %v1613_v2 = vpop.f32.mrb[28].mxu1 }
 0xce3   : > { %v2124_v4 = vpop.f32.mrb[29].mxu1  ;;  %v1617_v5 = vsel %vm410_vm2, %v1613_v2, -inf }
 0xce4   : > { %1618 = vmax.xlane.f32.xlu0 %v1617_v5  ;;  %v1944_v5 = vld [vmem:[%s2985_s3] ss:$0 sm:$0xff] }
 0xce8   : > { %759 = vadd.xlane.f32.xlu0 %v758_v1 }
 0xcec   : > { %932 = vadd.xlane.f32.xlu0 %v931_v6 }
 0xcf0   : > { %1105 = vadd.xlane.f32.xlu0 %v1104_v41 }
 0xcf4   : > { %1278 = vadd.xlane.f32.xlu0 %v1277_v53 }
 0xcf8   : > { %1451 = vadd.xlane.f32.xlu0 %v1450_v7 }
 0xd71   : > { %v1619_v8 = vpop.xlane.xlu0 %1618 }
 0xd72   : > { %v1620_v9 = vsub.f32 %v1613_v2, %v1619_v8 }
 0xd74   : > { %v1621_v10 = vmul.f32 1.442695, %v1620_v9 }
 0xd75   : > { %v760_v11 = vpop.xlane.xlu0 %759 }
 0xd76   : > { %2333 = vpow2.f32 %v1621_v10 }
 0xd77   : > { %2335 = vrcp.f32 %v760_v11 }
 0xd79   : > { %v933_v62 = vpop.xlane.xlu0 %932 }
 0xd7a   : > { %2337 = vrcp.f32 %v933_v62 }
 0xd7d   : > { %v1106_v12 = vpop.xlane.xlu0 %1105 }
 0xd80   : > { %v2334_v13 = vpop.eup %2333 }
 0xd81   : > { %v2336_v14 = vpop.eup %2335  ;;  %2128 = vmatmul.mubr.msk.f32.vlgmr.msra.gmra.mrb[30].mxu1 %vm410_vm2, %v2334_v13  ;;  %v1279_v16 = vpop.xlane.xlu0 %1278  ;;  %v1623_v17 = vsel %vm410_vm2, %v2334_v13, 0.0 }
 0xd82   : > { %2339 = vrcp.f32 %v1279_v16  ;;  %1624 = vadd.xlane.f32.xlu0 %v1623_v17  ;;  %v838_v18 = vmul.f32 %v2336_v14, %v2836_v3 }
 0xd83   : > { %2341 = vrcp.f32 %v1106_v12 }
 0xd84   : > { %v2338_v19 = vpop.eup %2337  ;;  %840 = vrot.lane.b32.xlu1 %v838_v18, %s2536_s24  ;;  %s1806_s24 = scalar_lea.sflag [#allocation6], %s2738_s29 }
 0xd85   : > { %v1011_v20 = vmul.f32 %v2338_v19, %v2855_v15  ;;  %v1452_v23 = vpop.xlane.xlu0 %1451  ;;  %v1711_v15 = vld [vmem:[#allocation9] sm:$0xff] }
 0xd86   : > { %2343 = vrcp.f32 %v1452_v23  ;;  %v2190_v31 = vpack.c.bf16 %v1712_v29, %v1711_v15 }
 0xd88   : > { %1013 = vrot.lane.b32.xlu1 %v1011_v20, %s2537_s20  ;;  %2191 = vmatpush3.bf16.msra.mxu0 %v2190_v31  ;;  %s2433_s20 = scalar_lea.vmem %s2940_s5, 128 }
 0xd89   : > { %2192 = vmatprep.subr.bf16.mxu0 %v2510_v0  ;;  %p2434_p11 = scmp.ne.s32.totalorder %s2940_s5, %s2433_s20 }
 0xd8b   : > { %p2435_p1 = pnand %p2434_p11, %p3000_p0 }
 0xd8c   : > { %v2340_v21 = vpop.eup %2339  ;;  %2194 = vmatpush3.bf16.msra.mxu0 %v2193_v33 }
 0xd8d   : > { %v1357_v22 = vmul.f32 %v2340_v21, %v2887_v42  ;;  %v2342_v24 = vpop.eup %2341  ;;  %2195 = vmatprep.subr.bf16.mxu0 %v2510_v0  ;;  %v1720_v42 = vld [vmem:[#allocation9 + $0x48] sm:$0xff]  ;;  %p2436_p3 = pneg %p2435_p1 }
 0xd8e   : > { %v1184_v3 = vmul.f32 %v2342_v24, %v2875_v28  ;;  %v1717_v28 = vld [vmem:[#allocation9 + $0x30] sm:$0xff]  ;;  %v2202_v43 = vpack.c.bf16 %v1720_v42, %v1719_v40 }
 0xd8f   : > { %1359 = vrot.lane.b32.xlu1 %v1357_v22, %s2538_s28  ;;  %v2199_v39 = vpack.c.bf16 %v1718_v37, %v1717_v28  ;;  %s2439_s28 = scalar_lea.vmem %s2438_s25, 256 }
 0xd90   : > { %v2344_v25 = vpop.eup %2343  ;;  %2197 = vmatpush3.bf16.msra.mxu0 %v2196_v36  ;;  %p2441_p9 = scmp.lt.s32.totalorder %s2439_s28, %s2433_s20 }
 0xd91   : > { %v1530_v26 = vmul.f32 %v2344_v25, %v1525_v61  ;;  %2198 = vmatprep.subr.bf16.mxu0 %v2510_v0 }
 0xd92   : > { %p2442_p12 = por %p2441_p9, %p2440_p7 }
 0xd94   : > { %2200 = vmatpush3.bf16.msra.mxu0 %v2199_v39  ;;  %p2443_p2 = pnand %p2442_p12, %p2436_p3 }
 0xd95   : > { %2201 = vmatprep.subr.bf16.mxu0 %v2510_v0 }
 0xd98   : > { %667 = vrot.lane.b32.xlu0 %v665_v58, %s2539_s11  ;;  %2203 = vmatpush3.bf16.msra.mxu0 %v2202_v43  ;;  %v2211_v58 = vpack.c.bf16 %v1726_v57, %v1725_v56 }
 0xd99   : > { %2204 = vmatprep.subr.bf16.mxu0 %v2510_v0 }
 0xd9c   : > { %1186 = vrot.lane.b32.xlu0 %v1184_v3, %s2540_s12  ;;  %2206 = vmatpush3.bf16.msra.mxu0 %v2205_v46 }
 0xd9d   : > { %2207 = vmatprep.subr.bf16.mxu0 %v2510_v0 }
 0xda0   : > { %1532 = vrot.lane.b32.xlu0 %v1530_v26, %s2541_s7  ;;  %2209 = vmatpush3.bf16.msra.mxu0 %v2208_v38 }
 0xda1   : > { %2210 = vmatprep.subr.bf16.mxu0 %v2510_v0 }
 0xda4   : > { %2212 = vmatpush3.bf16.msra.mxu0 %v2211_v58 }
 0xdf6   : > { %v841_v47 = vpop.permute.xlu1 %840 }
 0xdfa   : > { %v1014_v51 = vpop.permute.xlu1 %1013 }
 0xe01   : > { %v1360_v54 = vpop.permute.xlu1 %1359 }
 0xe0f   : > { %v1625_v48 = vpop.xlane.xlu0 %1624 }
 0xe10   : > { %2345 = vrcp.f32 %v1625_v48 }
 0xe13   : > { %v668_v49 = vpop.permute.xlu0 %667 }
 0xe14   : > { %671 = vst.msk [vmem:[#allocation3] sm:$0xff] %vm670_vm3, %v668_v49 }
 0xe15   : > { %844 = vst.msk [vmem:[#allocation3] sm:$0xff] %vm843_vm4, %v841_v47 }
 0xe16   : > { %1017 = vst.msk [vmem:[#allocation3] sm:$0xff] %vm1016_vm5, %v1014_v51 }
 0xe17   : > { %v1187_v52 = vpop.permute.xlu0 %1186 }
 0xe18   : > { %1190 = vst.msk [vmem:[#allocation3] sm:$0xff] %vm1189_vm6, %v1187_v52 }
 0xe19   : > { %1363 = vst.msk [vmem:[#allocation3] sm:$0xff] %vm1362_vm7, %v1360_v54 }
 0xe1a   : > { %v2346_v59 = vpop.eup %2345 }
 0xe1b   : > { %v1533_v55 = vpop.permute.xlu0 %1532 }
 0xe1c   : > { %1536 = vst.msk [vmem:[#allocation3] sm:$0xff] %vm1535_vm8, %v1533_v55 }
 0xe54   : > { %v1698_v60 = vpop.f32.mrb[30].mxu1 }
 0xe55   : > { %v1703_v61 = vmul.f32 %v2346_v59, %v1698_v60  ;;  %v2129_v63 = vpop.f32.mrb[31].mxu1 }
 0xe57   : > { %1705 = vrot.lane.b32.xlu1 %v1703_v61, %s2542_s8 }
 0xec9   : > { %v1706_v2 = vpop.permute.xlu1 %1705 }
 0xeca   : > { %1709 = vst.msk [vmem:[#allocation3] sm:$0xff] %vm1708_vm9, %v1706_v2 }
 0xed1   : > { %v1710_v4 = vld [vmem:[#allocation3] sm:$0xff] }
 0xed2   : > { %2163 = vmatmul.mubr.f32.vlgmr.msra.gmra.mrb[2].mxu0 %v1710_v4 }
 0xfa5   : > { %v1800_v0 = vpop.f32.mrb[2].mxu0 }
 0xfa6   : > { %v1801_v1 = vadd.f32 %v1944_v5, %v1800_v0  ;;  %v2164_v6 = vpop.f32.mrb[3].mxu0 }
 0xfa8   : > { %1804 = vst [vmem:[%s241_s30] sm:$0xff] %v1801_v1 }
 0xfa9   : > { %2446 = shalt.err (!%p2443_p2)
}
 0xfaa   : > { %s2447_s29 = scalar_lea.hbm %s2938_s10, 128  ;;  %s2451_s7 = scalar_lea.hbm %s2986_s4, 256 }
 0xfab   : > { %p2448_p13 = scmp.ne.s32.totalorder %s2938_s10, %s2447_s29  ;;  %p2452_p4 = scmp.lt.u32.totalorder %s2938_s10, %s2986_s4 }
 0xfac   : > { %p2453_p5 = scmp.lt.u32.totalorder %s2451_s7, %s2447_s29  ;;  %p2455_p11 = scmp.lt.u32.totalorder %s2447_s29, %s2938_s10 }
 0xfad   : > { %p2449_p6 = pnand %p2448_p13, %p3000_p0 }
 0xfae   : > { %p2454_p8 = por %p2453_p5, %p2452_p4 }
 0xfaf   : > { %p2450_p10 = pneg %p2449_p6 }
 0xfb0   : > { %p2456_p1 = por %p2455_p11, %p2454_p8 }
 0xfb2   : > { %p2457_p3 = pnand %p2456_p1, %p2450_p10 }
 0xfb4   : > { %2460 = shalt.err (!%p2457_p3)
}
 0xfb5   : > { %2223 = dma.vmem_to_hbm [thread:$0]  (%p3000_p0), %s2940_s5, 128, %s2938_s10, %s1806_s24  }
 0xfb6 PF: > { %s1831_s23 = sand.u32 1, %s2491_s15   ;;  %p3001_p7 = scmp.ne.s32.totalorder %s2991_s22, 0 }
 0xfb7   : > { %p3002_p9 = scmp.ge.s32.totalorder %s2503_s18, 2  ;;  %s1832_s27 = scalar_lea.sflag [#allocation6], %s1831_s23 }
 0xfb9   : > { %p2237_p12 = pnand %p3002_p9, %p3001_p7 }
 0xfbb   : > { %2486 = dma.done.wait (!%p2237_p12), %s1832_s27, 128  }
 0xfbc   : > { %2488 = vsyncadd (!%p2237_p12), %s1832_s27, 4294967168  ;;  %p18_p2 = scmp.ge.s32.totalorder %s2679_s9, 4   ;;  %s3003_s15 = smov %s2495_s16 }
 0xfbd   : > { %s3004_s16 = smov %s2499_s17  ;;  %s3005_s17 = smov %s2695_s14 }
 0xfbe   : > { %s3006_s18 = smov %s2679_s9  ;;  %20 = sbr.rel (!%p18_p2) target bundleno = 6 (0x6), region = 89 }
 0xfc5   :  { %1837 = vsyncpa [#allocation5], 1 }
 0xfc6   :  { %1839 = vsyncpa [#allocation5 + $0x1], 1 }
 0xfc7   :  { %1840 = vsyncpa [#allocation8], 1 }
 0xfc8   :  { %1841 = vsyncpa [#allocation6], 1 }
 0xfc9   :  { %1843 = vsyncpa [#allocation6 + $0x1], 1 }

</bundles_post_ra>
